<compile_context>
chip_gen: v7x
topology: tpu7x:2x2x1
jax: 0.10.0
libtpu: 0.0.40
codegen_flags: <defaults>
</compile_context>

<pallas_src>
import math

import jax
import jax.numpy as jnp
from jax.experimental import pallas as pl
from jax.experimental.pallas import tpu as pltpu

D_IN = 784          # 1*28*28
H_PAD = 64          # 50 -> 64 (multiple of 8 sublanes; last dim == full array dim)
NUM_CLASSES = 10    # output written at its natural width (10 == full array dim)
DEFAULT_TB = 1024   # max batch rows per grid step


def _round_up(n, m):
    return ((n + m - 1) // m) * m


def _cdiv(a, b):
    return -(-a // b)


def _mlp_kernel(x_ref, w1_ref, b1_ref, w2_ref, b2_ref, w3_ref, b3_ref, o_ref):
    # x_ref: [TB, 784] f32 (cast to bf16 in-kernel); weights bf16; biases f32.
    x = x_ref[...].astype(jnp.bfloat16)                                    # VPU cast, hidden under DMA
    h1 = jnp.dot(x, w1_ref[...], preferred_element_type=jnp.float32)      # [TB, 64] f32
    h1 = jnp.maximum(h1 + b1_ref[...], 0.0).astype(jnp.bfloat16)          # ReLU(fc1)
    h2 = jnp.dot(h1, w2_ref[...], preferred_element_type=jnp.float32)     # [TB, 64] f32
    h2 = jnp.maximum(h2 + b2_ref[...], 0.0).astype(jnp.bfloat16)          # ReLU(fc2)
    out = jnp.dot(h2, w3_ref[...], preferred_element_type=jnp.float32)    # [TB, 10] f32
    o_ref[...] = (out + b3_ref[...]).astype(o_ref.dtype)                  # fc3 (no activation)


def _pad2(a, shape, dtype):
    out = jnp.zeros(shape, dtype)
    return out.at[: a.shape[0], : a.shape[1]].set(a.astype(dtype))


def fcn_mnist_forward(x, params, *, tb=DEFAULT_TB):
    """x: [B, 1, 28, 28] float32 (NCHW). Returns logits [B, 10] float32."""
    w1, b1, w2, b2, w3, b3 = params  # weights stored [in_features, out_features]
    B = x.shape[0]
    x_flat = x.reshape(B, D_IN)      # contiguous metadata reshape; stays f32 in HBM

    # Batch tile: multiple of 8 sublanes, <= tb, and small enough that large
    # batches produce a grid of >=2 steps (lets v7x shard over both TCs).
    TB = min(tb, max(8, _round_up(_cdiv(B, 2), 8)))
    grid = (pl.cdiv(B, TB),)

    # Pad parameters (zero padding is exact through matmul + ReLU).
    w1p = _pad2(w1, (D_IN, H_PAD), jnp.bfloat16)
    b1p = _pad2(b1, (1, H_PAD), jnp.float32)
    w2p = _pad2(w2, (H_PAD, H_PAD), jnp.bfloat16)
    b2p = _pad2(b2, (1, H_PAD), jnp.float32)
    w3p = _pad2(w3, (H_PAD, NUM_CLASSES), jnp.bfloat16)
    b3p = _pad2(b3, (1, NUM_CLASSES), jnp.float32)

    const2d = lambda i: (0, 0)
    in_specs = [
        pl.BlockSpec((TB, D_IN), lambda i: (i, 0)),         # x tile, streamed/pipelined
        pl.BlockSpec((D_IN, H_PAD), const2d),               # weights/biases: VMEM-resident
        pl.BlockSpec((1, H_PAD), const2d),
        pl.BlockSpec((H_PAD, H_PAD), const2d),
        pl.BlockSpec((1, H_PAD), const2d),
        pl.BlockSpec((H_PAD, NUM_CLASSES), const2d),
        pl.BlockSpec((1, NUM_CLASSES), const2d),
    ]
    out_specs = pl.BlockSpec((TB, NUM_CLASSES), lambda i: (i, 0))

    flops = 2 * B * (D_IN * H_PAD + H_PAD * H_PAD + H_PAD * NUM_CLASSES)
    bytes_accessed = (
        B * D_IN * 4                                               # x (f32)
        + (D_IN * H_PAD + H_PAD * H_PAD + H_PAD * NUM_CLASSES) * 2  # weights (bf16)
        + (2 * H_PAD + NUM_CLASSES) * 4                            # biases (f32)
        + B * NUM_CLASSES * 4                                      # output (f32)
    )

    out = pl.pallas_call(
        _mlp_kernel,
        out_shape=jax.ShapeDtypeStruct((B, NUM_CLASSES), jnp.float32),
        grid=grid,
        in_specs=in_specs,
        out_specs=out_specs,
        compiler_params=pltpu.CompilerParams(
            dimension_semantics=("parallel",),
        ),
        cost_estimate=pl.CostEstimate(
            flops=flops, transcendentals=0, bytes_accessed=bytes_accessed
        ),
    )(x_flat, w1p, b1p, w2p, b2p, w3p, b3p)

    return out


def init_params(key):
    """Mimics nn.Linear default init (uniform +-1/sqrt(fan_in)).
    Weights stored as [in_features, out_features] (transpose of PyTorch)."""
    dims = [(D_IN, 50), (50, 50), (50, NUM_CLASSES)]
    params = []
    for fan_in, fan_out in dims:
        key, kw, kb = jax.random.split(key, 3)
        bound = 1.0 / math.sqrt(fan_in)
        w = jax.random.uniform(kw, (fan_in, fan_out), jnp.float32, -bound, bound)
        b = jax.random.uniform(kb, (1, fan_out), jnp.float32, -bound, bound)
        params.extend([w, b])
    return tuple(params)


if __name__ == "__main__":
    key = jax.random.PRNGKey(0)
    key, kx = jax.random.split(key)
    params = init_params(key)

    B = 2
    x = jax.random.normal(kx, (B, 1, 28, 28), jnp.float32)  # NCHW MNIST-like input

    logits = fcn_mnist_forward(x, params)
    jax.block_until_ready(logits)
    assert logits.shape == (B, NUM_CLASSES)

    # Reference 1: mirror the kernel's bf16 quantization (tight check).
    w1, b1, w2, b2, w3, b3 = params
    xf = x.reshape(B, -1).astype(jnp.bfloat16)
    h1 = jnp.maximum(
        jnp.dot(xf, w1.astype(jnp.bfloat16), preferred_element_type=jnp.float32) + b1, 0.0
    ).astype(jnp.bfloat16)
    h2 = jnp.maximum(
        jnp.dot(h1, w2.astype(jnp.bfloat16), preferred_element_type=jnp.float32) + b2, 0.0
    ).astype(jnp.bfloat16)
    ref_q = jnp.dot(h2, w3.astype(jnp.bfloat16), preferred_element_type=jnp.float32) + b3
    assert jnp.allclose(logits, ref_q, atol=1e-2, rtol=1e-2)

    # Reference 2: full-f32 reference (loose check, bf16 rounding only).
    xf32 = x.reshape(B, -1)
    ref = jnp.maximum(xf32 @ w1 + b1, 0.0)
    ref = jnp.maximum(ref @ w2 + b2, 0.0)
    ref = ref @ w3 + b3
    assert jnp.allclose(logits, ref, atol=1e-1, rtol=1e-1)

    print("KERNEL_OK")
</pallas_src>

<mosaic_0001>
module attributes {stable_mosaic.version = 11 : i64} {
  func.func @_mlp_kernel(%arg0: i32, %arg1: memref<8x784xf32, #tpu.memory_space<vmem>>, %arg2: memref<784x64xbf16, #tpu.memory_space<vmem>>, %arg3: memref<1x64xf32, #tpu.memory_space<vmem>>, %arg4: memref<64x64xbf16, #tpu.memory_space<vmem>>, %arg5: memref<1x64xf32, #tpu.memory_space<vmem>>, %arg6: memref<64x10xbf16, #tpu.memory_space<vmem>>, %arg7: memref<1x10xf32, #tpu.memory_space<vmem>>, %arg8: memref<8x10xf32, #tpu.memory_space<vmem>>) attributes {dimension_semantics = [#tpu.dimension_semantics<parallel>], iteration_bounds = array<i64: 1>, scalar_prefetch = 0 : i64, scratch_operands = 0 : i64, tpu.core_type = #tpu.core_type<tc>, window_params = [{transform_indices = @transform_0, window_bounds = array<i64: 8, 784>}, {pipeline_mode = #tpu.pipeline_mode<synchronous>, transform_indices = @transform_1, window_bounds = array<i64: 784, 64>}, {pipeline_mode = #tpu.pipeline_mode<synchronous>, transform_indices = @transform_2, window_bounds = array<i64: 1, 64>}, {pipeline_mode = #tpu.pipeline_mode<synchronous>, transform_indices = @transform_3, window_bounds = array<i64: 64, 64>}, {pipeline_mode = #tpu.pipeline_mode<synchronous>, transform_indices = @transform_4, window_bounds = array<i64: 1, 64>}, {pipeline_mode = #tpu.pipeline_mode<synchronous>, transform_indices = @transform_5, window_bounds = array<i64: 64, 10>}, {pipeline_mode = #tpu.pipeline_mode<synchronous>, transform_indices = @transform_6, window_bounds = array<i64: 1, 10>}, {transform_indices = @transform_7, window_bounds = array<i64: 8, 10>}]} {
    %c0 = arith.constant 0 : index
    %c0_0 = arith.constant 0 : index
    %0 = vector.load %arg1[%c0, %c0_0] : memref<8x784xf32, #tpu.memory_space<vmem>>, vector<8x784xf32>
    %1 = arith.truncf %0 : vector<8x784xf32> to vector<8x784xbf16>
    %c0_1 = arith.constant 0 : index
    %c0_2 = arith.constant 0 : index
    %2 = vector.load %arg2[%c0_1, %c0_2] : memref<784x64xbf16, #tpu.memory_space<vmem>>, vector<784x64xbf16>
    %cst = arith.constant dense<0.000000e+00> : vector<8x64xf32>
    %3 = tpu.matmul %1, %2, %cst {dimension_numbers = #tpu.dot_dimension_numbers<[1], [0], [0], [1], [0, 0, 1, 1], [], []>} : vector<8x784xbf16>, vector<784x64xbf16>, vector<8x64xf32> -> vector<8x64xf32>
    %c0_3 = arith.constant 0 : index
    %c0_4 = arith.constant 0 : index
    %4 = vector.load %arg3[%c0_3, %c0_4] : memref<1x64xf32, #tpu.memory_space<vmem>>, vector<1x64xf32>
    %5 = vector.broadcast %4 : vector<1x64xf32> to vector<8x64xf32>
    %6 = arith.addf %3, %5 : vector<8x64xf32>
    %cst_5 = arith.constant 0.000000e+00 : f32
    %7 = vector.broadcast %cst_5 : f32 to vector<8x64xf32>
    %8 = arith.maximumf %6, %7 : vector<8x64xf32>
    %9 = arith.truncf %8 : vector<8x64xf32> to vector<8x64xbf16>
    %c0_6 = arith.constant 0 : index
    %c0_7 = arith.constant 0 : index
    %10 = vector.load %arg4[%c0_6, %c0_7] : memref<64x64xbf16, #tpu.memory_space<vmem>>, vector<64x64xbf16>
    %cst_8 = arith.constant dense<0.000000e+00> : vector<8x64xf32>
    %11 = tpu.matmul %9, %10, %cst_8 {dimension_numbers = #tpu.dot_dimension_numbers<[1], [0], [0], [1], [0, 0, 1, 1], [], []>} : vector<8x64xbf16>, vector<64x64xbf16>, vector<8x64xf32> -> vector<8x64xf32>
    %c0_9 = arith.constant 0 : index
    %c0_10 = arith.constant 0 : index
    %12 = vector.load %arg5[%c0_9, %c0_10] : memref<1x64xf32, #tpu.memory_space<vmem>>, vector<1x64xf32>
    %13 = vector.broadcast %12 : vector<1x64xf32> to vector<8x64xf32>
    %14 = arith.addf %11, %13 : vector<8x64xf32>
    %cst_11 = arith.constant 0.000000e+00 : f32
    %15 = vector.broadcast %cst_11 : f32 to vector<8x64xf32>
    %16 = arith.maximumf %14, %15 : vector<8x64xf32>
    %17 = arith.truncf %16 : vector<8x64xf32> to vector<8x64xbf16>
    %c0_12 = arith.constant 0 : index
    %c0_13 = arith.constant 0 : index
    %18 = vector.load %arg6[%c0_12, %c0_13] : memref<64x10xbf16, #tpu.memory_space<vmem>>, vector<64x10xbf16>
    %cst_14 = arith.constant dense<0.000000e+00> : vector<8x10xf32>
    %19 = tpu.matmul %17, %18, %cst_14 {dimension_numbers = #tpu.dot_dimension_numbers<[1], [0], [0], [1], [0, 0, 1, 1], [], []>} : vector<8x64xbf16>, vector<64x10xbf16>, vector<8x10xf32> -> vector<8x10xf32>
    %c0_15 = arith.constant 0 : index
    %c0_16 = arith.constant 0 : index
    %20 = vector.load %arg7[%c0_15, %c0_16] : memref<1x10xf32, #tpu.memory_space<vmem>>, vector<1x10xf32>
    %21 = vector.broadcast %20 : vector<1x10xf32> to vector<8x10xf32>
    %22 = arith.addf %19, %21 : vector<8x10xf32>
    %c0_17 = arith.constant 0 : index
    %c0_18 = arith.constant 0 : index
    %23 = vector.load %arg8[%c0_17, %c0_18] : memref<8x10xf32, #tpu.memory_space<vmem>>, vector<8x10xf32>
    tpu.vector_store %arg8[%c0_17, %c0_18], %22 {strides = array<i32>} : memref<8x10xf32, #tpu.memory_space<vmem>>, vector<8x10xf32>,
    return
  }
  func.func @transform_0(%arg0: i32) -> (i32, i32) {
    %c0_i32 = arith.constant 0 : i32
    %c0_i32_0 = arith.constant 0 : i32
    return %arg0, %c0_i32 : i32, i32
  }
  func.func @transform_1(%arg0: i32) -> (i32, i32) {
    %c0_i32 = arith.constant 0 : i32
    %c0_i32_0 = arith.constant 0 : i32
    %c0_i32_1 = arith.constant 0 : i32
    return %c0_i32, %c0_i32_0 : i32, i32
  }
  func.func @transform_2(%arg0: i32) -> (i32, i32) {
    %c0_i32 = arith.constant 0 : i32
    %c0_i32_0 = arith.constant 0 : i32
    %c0_i32_1 = arith.constant 0 : i32
    return %c0_i32, %c0_i32_0 : i32, i32
  }
  func.func @transform_3(%arg0: i32) -> (i32, i32) {
    %c0_i32 = arith.constant 0 : i32
    %c0_i32_0 = arith.constant 0 : i32
    %c0_i32_1 = arith.constant 0 : i32
    return %c0_i32, %c0_i32_0 : i32, i32
  }
  func.func @transform_4(%arg0: i32) -> (i32, i32) {
    %c0_i32 = arith.constant 0 : i32
    %c0_i32_0 = arith.constant 0 : i32
    %c0_i32_1 = arith.constant 0 : i32
    return %c0_i32, %c0_i32_0 : i32, i32
  }
  func.func @transform_5(%arg0: i32) -> (i32, i32) {
    %c0_i32 = arith.constant 0 : i32
    %c0_i32_0 = arith.constant 0 : i32
    %c0_i32_1 = arith.constant 0 : i32
    return %c0_i32, %c0_i32_0 : i32, i32
  }
  func.func @transform_6(%arg0: i32) -> (i32, i32) {
    %c0_i32 = arith.constant 0 : i32
    %c0_i32_0 = arith.constant 0 : i32
    %c0_i32_1 = arith.constant 0 : i32
    return %c0_i32, %c0_i32_0 : i32, i32
  }
  func.func @transform_7(%arg0: i32) -> (i32, i32) {
    %c0_i32 = arith.constant 0 : i32
    %c0_i32_0 = arith.constant 0 : i32
    return %arg0, %c0_i32 : i32, i32
  }
}

</mosaic_0001>

<bundles_post_ra>
// kernel: tpu_custom_call.1
= control target key start
LH: loop header
LB: loop body
LE: loop exit
PB: predicated region body
PF: predicated region fallthrough
CT: control target
= control target key end

     0   :  { %12 = vsyncpa [#allocation3], 0  ;;  %v51_v28 = vlaneseq  ;;  %v1149_v33 = vmov 1983009808   ;;  %v1150_v43 = vmov 0.0   ;;  %vm1151_vm0 = vmmov 0   ;;  %s1429_s0 = inlined_call_operand.vmem [shape: f32[2,784], index: 0, kind: input, shape index: {}]   ;;  %s1430_s1 = inlined_call_operand.vmem [shape: bf16[784,64], index: 1, kind: input, shape index: {}]   ;;  %s1431_s2 = inlined_call_operand.vmem [shape: f32[1,64], index: 2, kind: input, shape index: {}]   ;;  %s1432_s3 = inlined_call_operand.vmem [shape: bf16[64,64], index: 3, kind: input, shape index: {}]   ;;  %s1433_s4 = inlined_call_operand.vmem [shape: f32[1,64], index: 4, kind: input, shape index: {}]   ;;  %s1434_s5 = inlined_call_operand.vmem [shape: bf16[64,10], index: 5, kind: input, shape index: {}]   ;;  %s1435_s6 = inlined_call_operand.vmem [shape: f32[1,10], index: 6, kind: input, shape index: {}]   ;;  %s1436_s7 = inlined_call_operand.hbm [shape: f32[2,10], index: 7, kind: output, shape index: {}]  }
   0x1   :  { %v1056_v0 = vld [vmem:[%s1430_s1 + $0x40] sm:$0xff]   ;;  %v1060_v4 = vld [vmem:[%s1430_s1 + $0x48] sm:$0xff]   ;;  %v1064_v8 = vld [vmem:[%s1430_s1 + $0x50] sm:$0xff]   ;;  %v49_v34 = vunpack.c.l.s4 %v1149_v33  ;;  %vm528_vm1 = vcmask 130048   ;;  %vm733_vm2 = vcmask 523264   ;;  %vm861_vm3 = vcmask 80896  }
   0x2   :  { %v1057_v1 = vld [vmem:[%s1430_s1] sm:$0xff]   ;;  %942 = vmatprep.subr.bf16.mxu0 %v1056_v0  ;;  %v1061_v5 = vld [vmem:[%s1430_s1 + $0x8] sm:$0xff]   ;;  %v1065_v9 = vld [vmem:[%s1430_s1 + $0x10] sm:$0xff]   ;;  %v52_v35 = vshrl.u32 %v51_v28, 7 }
   0x3   :  { %v1058_v2 = vld [vmem:[%s1430_s1 + $0xc0] sm:$0xff]   ;;  %943 = vmatpush3.bf16.msra.mxu0 %v1057_v1  ;;  %v1062_v6 = vld [vmem:[%s1430_s1 + $0xc8] sm:$0xff]   ;;  %v1066_v10 = vld [vmem:[%s1430_s1 + $0xd0] sm:$0xff]   ;;  %v50_v37 = vunpack.c.0.s8 %v49_v34 }
   0x4   :  { %v1059_v3 = vld [vmem:[%s1430_s1 + $0x80] sm:$0xff]   ;;  %964 = vmatprep.subr.bf16.mxu1 %v1058_v2  ;;  %944 = vmatprep.subr.bf16.mxu0 %v1060_v4  ;;  %v1063_v7 = vld [vmem:[%s1430_s1 + $0x88] sm:$0xff]   ;;  %v1067_v11 = vld [vmem:[%s1430_s1 + $0x90] sm:$0xff]  }
   0x5   :  { %965 = vmatpush3.bf16.msra.mxu1 %v1059_v3  ;;  %v1068_v12 = vld [vmem:[%s1430_s1 + $0x58] sm:$0xff]   ;;  %v1072_v16 = vld [vmem:[%s1430_s1 + $0x60] sm:$0xff]   ;;  %v1076_v20 = vld [vmem:[%s1430_s1 + $0x68] sm:$0xff]   ;;  %v53_v42 = vsub.s32 %v50_v37, %v52_v35 }
   0x6   :  { %966 = vmatprep.subr.bf16.mxu1 %v1062_v6  ;;  %v1069_v13 = vld [vmem:[%s1430_s1 + $0x18] sm:$0xff]   ;;  %v1073_v17 = vld [vmem:[%s1430_s1 + $0x20] sm:$0xff]   ;;  %v1077_v21 = vld [vmem:[%s1430_s1 + $0x28] sm:$0xff]  }
   0x7   :  { %945 = vmatpush3.bf16.msra.mxu0 %v1061_v5  ;;  %v1070_v14 = vld [vmem:[%s1430_s1 + $0xd8] sm:$0xff]   ;;  %v1074_v18 = vld [vmem:[%s1430_s1 + $0xe0] sm:$0xff]   ;;  %v1078_v22 = vld [vmem:[%s1430_s1 + $0xe8] sm:$0xff]  }
   0x8   :  { %946 = vmatprep.subr.bf16.mxu0 %v1064_v8  ;;  %v1071_v15 = vld [vmem:[%s1430_s1 + $0x98] sm:$0xff]   ;;  %v1075_v19 = vld [vmem:[%s1430_s1 + $0xa0] sm:$0xff]   ;;  %v1079_v23 = vld [vmem:[%s1430_s1 + $0xa8] sm:$0xff]  }
   0x9   :  { %967 = vmatpush3.bf16.msra.mxu1 %v1063_v7  ;;  %v1080_v24 = vld [vmem:[%s1430_s1 + $0x70] sm:$0xff]   ;;  %v1084_v29 = vld [vmem:[%s1430_s1 + $0x78] sm:$0xff]   ;;  %v1092_v39 = vld [vmem:[%s1430_s1 + $0x140] sm:$0xff]  }
   0xa   :  { %968 = vmatprep.subr.bf16.mxu1 %v1066_v10  ;;  %v1081_v25 = vld [vmem:[%s1430_s1 + $0x30] sm:$0xff]   ;;  %v1085_v30 = vld [vmem:[%s1430_s1 + $0x38] sm:$0xff]   ;;  %v1095_v55 = vld [vmem:[%s1430_s1 + $0x100] sm:$0xff]  }
   0xb   :  { %947 = vmatpush3.bf16.msra.mxu0 %v1065_v9  ;;  %v1082_v26 = vld [vmem:[%s1430_s1 + $0xf0] sm:$0xff]   ;;  %v1086_v31 = vld [vmem:[%s1430_s1 + $0xf8] sm:$0xff]   ;;  %v1096_v57 = vld [vmem:[%s1430_s1 + $0x148] sm:$0xff]  }
   0xc   :  { %948 = vmatprep.subr.bf16.mxu0 %v1068_v12  ;;  %v1083_v27 = vld [vmem:[%s1430_s1 + $0xb0] sm:$0xff]   ;;  %v1089_v36 = vld [vmem:[%s1429_s0 + $0x1c] ss:$14 sps:$4 sm:$0xff]   ;;  %v1110_v62 = vld [vmem:[%s1430_s1 + $0x180] sm:$0xff]  }
   0xd   :  { %969 = vmatpush3.bf16.msra.mxu1 %v1067_v11  ;;  %v1087_v32 = vld [vmem:[%s1429_s0] ss:$14 sps:$4 sm:$0xff]   ;;  %v1091_v38 = vld [vmem:[%s1430_s1 + $0xb8] sm:$0xff]   ;;  %v1093_v40 = vld [vmem:[%s1429_s0 + $0x4] ss:$14 sps:$4 sm:$0xff]   ;;  %v68_v45 = vrot.slane %v1089_v36, %v53_v42 }
   0xe   :  { %970 = vmatprep.subr.bf16.mxu1 %v1070_v14  ;;  %v1094_v41 = vld [vmem:[%s1429_s0 + $0x20] ss:$14 sps:$4 sm:$0xff]   ;;  %v54_v44 = vrot.slane %v1087_v32, %v53_v42  ;;  %v61_v46 = vrot.slane %v1093_v40, %v53_v42  ;;  %v1100_v61 = vld [vmem:[%s1430_s1 + $0x158] sm:$0xff]   ;;  %v1114_v2 = vld [vmem:[%s1429_s0 + $0x24] ss:$14 sps:$4 sm:$0xff]  }
   0xf   :  { %949 = vmatpush3.bf16.msra.mxu0 %v1069_v13  ;;  %v75_v47 = vrot.slane %v1094_v41, %v53_v42  ;;  %v1097_v58 = vld [vmem:[%s1430_s1 + $0x108] sm:$0xff]   ;;  %v1098_v59 = vld [vmem:[%s1430_s1 + $0x150] sm:$0xff]   ;;  %v1101_v63 = vld [vmem:[%s1430_s1 + $0x118] sm:$0xff]   ;;  %v104_v6 = vrot.slane %v1114_v2, %v53_v42 }
  0x10   :  { %950 = vmatprep.subr.bf16.mxu0 %v1072_v16  ;;  %v77_v48 = vcombine.high %v54_v44, %v68_v45  ;;  %v76_v49 = vcombine.low %v54_v44, %v68_v45  ;;  %v1099_v60 = vld [vmem:[%s1430_s1 + $0x110] sm:$0xff]   ;;  %v1102_v0 = vld [vmem:[%s1430_s1 + $0x160] sm:$0xff]   ;;  %v1113_v3 = vld [vmem:[%s1429_s0 + $0xc] ss:$14 sps:$4 sm:$0x33]  }
  0x11   :  { %971 = vmatpush3.bf16.msra.mxu1 %v1071_v15  ;;  %v79_v50 = vcombine.high %v61_v46, %v75_v47  ;;  %v78_v51 = vcombine.low %v61_v46, %v75_v47  ;;  %v1111_v1 = vld [vmem:[%s1429_s0 + $0x8] ss:$14 sps:$4 sm:$0xff]   ;;  %v1103_v7 = vld [vmem:[%s1430_s1 + $0x120] sm:$0xff]   ;;  %v97_v8 = vrot.slane %v1113_v3, %v53_v42 }
  0x12   :  { %972 = vmatprep.subr.bf16.mxu1 %v1074_v18  ;;  %v123_v52 = vpack.c.bf16 %v77_v48, %v77_v48  ;;  %v122_v53 = vpack.c.bf16 %v76_v49, %v76_v49  ;;  %v1116_v4 = vld [vmem:[%s1429_s0 + $0x28] ss:$14 sps:$4 sm:$0x33]   ;;  %v90_v5 = vrot.slane %v1111_v1, %v53_v42  ;;  %v1108_v18 = vld [vmem:[%s1430_s1 + $0x178] sm:$0xff]   ;;  %v879_v28 = vld [vmem:[%s1431_s2] ss:$0 sm:$0xff] }
  0x13   :  { %951 = vmatpush3.bf16.msra.mxu0 %v1073_v17  ;;  %v125_v54 = vpack.c.bf16 %v79_v50, %v79_v50  ;;  %v124_v56 = vpack.c.bf16 %v78_v51, %v78_v51  ;;  %v111_v9 = vrot.slane %v1116_v4, %v53_v42  ;;  %v1104_v10 = vld [vmem:[%s1430_s1 + $0x168] sm:$0xff]   ;;  %v1106_v16 = vld [vmem:[%s1430_s1 + $0x170] sm:$0xff]  }
  0x14   :  { %952 = vmatprep.subr.bf16.mxu0 %v1076_v20  ;;  %564 = vmatprep.mubr.bf16.mxu0 %v123_v52  ;;  %v113_v11 = vcombine.high %v90_v5, %v104_v6  ;;  %v1105_v15 = vld [vmem:[%s1430_s1 + $0x128] sm:$0xff]   ;;  %v1107_v17 = vld [vmem:[%s1430_s1 + $0x130] sm:$0xff]   ;;  %v1109_v20 = vld [vmem:[%s1430_s1 + $0x138] sm:$0xff]  }
  0x15   :  { %973 = vmatpush3.bf16.msra.mxu1 %v1075_v19  ;;  %604 = vmatprep.mubr.bf16.mxu1 %v125_v54  ;;  %v114_v12 = vcombine.low %v97_v8, %v111_v9  ;;  %v112_v19 = vcombine.low %v90_v5, %v104_v6  ;;  %v1121_v52 = vld [vmem:[%s1434_s5] sm:$0xff]   ;;  %v1122_v54 = vld [vmem:[%s1434_s5 + $0x8] sm:$0xff]  }
  0x16   :  { %974 = vmatprep.subr.bf16.mxu1 %v1078_v22  ;;  %v127_v13 = vpack.c.bf16 %v113_v11, %v113_v11  ;;  %v1117_v22 = vld [vmem:[%s1432_s3] sm:$0xff]  }
  0x17   :  { %953 = vmatpush3.bf16.msra.mxu0 %v1077_v21  ;;  %v128_v14 = vpack.c.bf16 %v114_v12, %v114_v12  ;;  %v126_v21 = vpack.c.bf16 %v112_v19, %v112_v19 }
  0x18   :  { %954 = vmatprep.subr.bf16.mxu0 %v1080_v24  ;;  %v1119_v24 = vld [vmem:[%s1432_s3 + $0x10] sm:$0xff]  }
  0x19   :  { %975 = vmatpush3.bf16.msra.mxu1 %v1079_v23  ;;  %v1118_v23 = vld [vmem:[%s1432_s3 + $0x8] sm:$0xff]  }
  0x1a   :  { %976 = vmatprep.subr.bf16.mxu1 %v1082_v26 }
  0x1b   :  { %955 = vmatpush3.bf16.msra.mxu0 %v1081_v25  ;;  %v1120_v25 = vld [vmem:[%s1432_s3 + $0x18] sm:$0xff]  }
  0x1c   :  { %956 = vmatprep.subr.bf16.mxu0 %v1084_v29 }
  0x1d   :  { %977 = vmatpush3.bf16.msra.mxu1 %v1083_v27 }
  0x1e   :  { %978 = vmatprep.subr.bf16.mxu1 %v1086_v31 }
  0x1f   :  { %957 = vmatpush3.bf16.msra.mxu0 %v1085_v30 }
  0x20   :  { %986 = vmatprep.subr.bf16.mxu0 %v1092_v39 }
  0x21   :  { %979 = vmatpush3.bf16.msra.mxu1 %v1091_v38 }
  0x22   :  { %1020 = vmatprep.subr.bf16.mxu1 %v1150_v43  ;;  %565 = vmatmul.mubr.bf16.vlgmr.msra.gmra.mrb[0].mxu0 %v122_v53 }
  0x23   :  { %987 = vmatpush3.bf16.msra.mxu0 %v1095_v55  ;;  %644 = vmatprep.mubr.bf16.mxu0 %v127_v13  ;;  %v1123_v55 = vld [vmem:[%s1434_s5 + $0x10] sm:$0xff]  }
  0x24   :  { %605 = vmatmul.mubr.bf16.vlgmr.msra.gmra.mrb[0].mxu1 %v124_v56  ;;  %988 = vmatprep.subr.bf16.mxu0 %v1096_v57  ;;  %v1124_v56 = vld [vmem:[%s1434_s5 + $0x18] sm:$0xff]   ;;  %v930_v57 = vld [vmem:[%s1433_s4] ss:$0 sm:$0xff] }
  0x25   :  { %1022 = vmatprep.mubr.msk.bf16.mxu1 %vm1151_vm0, %v1150_v43  ;;  %1021 = vmatpush3.bf16.msra.mxu1 %v1110_v62 }
  0x26   :  { %1026 = vmatprep.subr.bf16.mxu1 %v1150_v43 }
  0x27   :  { %989 = vmatpush3.bf16.msra.mxu0 %v1097_v58 }
  0x28   :  { %990 = vmatprep.subr.bf16.mxu0 %v1098_v59 }
  0x2b   :  { %991 = vmatpush3.bf16.msra.mxu0 %v1099_v60 }
  0x2c   :  { %992 = vmatprep.subr.bf16.mxu0 %v1100_v61  ;;  %1023 = vmatmul.mubr.msk.bf16.vlgmr.msra.gmra.mrb[4].mxu1 %vm528_vm1, %v128_v14 }
  0x2d   :  { %1034 = vmatprep.mubr.msk.bf16.mxu1 %vm1151_vm0, %v1150_v43  ;;  %1027 = vmatpush3.bf16.msra.mxu1 %v1117_v22 }
  0x2e   :  { %1028 = vmatprep.subr.bf16.mxu1 %v1150_v43 }
  0x2f   :  { %993 = vmatpush3.bf16.msra.mxu0 %v1101_v63 }
  0x30   :  { %994 = vmatprep.subr.bf16.mxu0 %v1102_v0 }
  0x31   :  { %1029 = vmatpush3.bf16.msra.mxu1 %v1118_v23 }
  0x32   :  { %1030 = vmatprep.subr.bf16.mxu1 %v1150_v43 }
  0x33   :  { %995 = vmatpush3.bf16.msra.mxu0 %v1103_v7 }
  0x34   :  { %996 = vmatprep.subr.bf16.mxu0 %v1104_v10 }
  0x35   :  { %1031 = vmatpush3.bf16.msra.mxu1 %v1119_v24 }
  0x36   :  { %1032 = vmatprep.subr.bf16.mxu1 %v1150_v43 }
  0x37   :  { %997 = vmatpush3.bf16.msra.mxu0 %v1105_v15 }
  0x38   :  { %998 = vmatprep.subr.bf16.mxu0 %v1106_v16 }
  0x39   :  { %1033 = vmatpush3.bf16.msra.mxu1 %v1120_v25 }
  0x3a   :  { %1038 = vmatprep.subr.bf16.mxu1 %v1150_v43 }
  0x3b   :  { %999 = vmatpush3.bf16.msra.mxu0 %v1107_v17 }
  0x3c   :  { %1000 = vmatprep.subr.bf16.mxu0 %v1108_v18 }
  0x3f   :  { %1001 = vmatpush3.bf16.msra.mxu0 %v1109_v20 }
  0x42   :  { %645 = vmatmul.mubr.bf16.vlgmr.msra.gmra.mrb[4].mxu0 %v126_v21 }
  0xf5   :  { %v958_v26 = vpop.f32.mrb[0].mxu0 }
  0xf6   :  { %v959_v29 = vpop.f32.mrb[1].mxu0 }
  0xf7   :  { %v980_v27 = vpop.f32.mrb[0].mxu1  ;;  %v960_v31 = vadd.f32 %v959_v29, %v958_v26  ;;  %v961_v32 = vpop.f32.mrb[2].mxu0 }
  0xf8   :  { %v981_v30 = vpop.f32.mrb[1].mxu1  ;;  %v962_v35 = vpop.f32.mrb[3].mxu0 }
  0xf9   :  { %v982_v33 = vadd.f32 %v981_v30, %v980_v27  ;;  %v983_v34 = vpop.f32.mrb[2].mxu1  ;;  %v567_v37 = vadd.f32 %v960_v31, %v879_v28 }
  0xfa   :  { %v984_v36 = vpop.f32.mrb[3].mxu1 }
  0xfb   :  { %v607_v38 = vadd.f32 %v982_v33, %v567_v37 }
  0xff   :  { %v686_v39 = vpop.f32.mrb[4].mxu1 }
 0x100   :  { %v1024_v40 = vpop.f32.mrb[5].mxu1 }
 0x101   :  { %v689_v41 = vpop.f32.mrb[6].mxu1 }
 0x102   :  { %v1025_v42 = vpop.f32.mrb[7].mxu1 }
 0x115   :  { %v1002_v44 = vpop.f32.mrb[4].mxu0 }
 0x116   :  { %v1003_v45 = vpop.f32.mrb[5].mxu0 }
 0x117   :  { %v1004_v46 = vadd.f32 %v1003_v45, %v1002_v44  ;;  %v1005_v47 = vpop.f32.mrb[6].mxu0 }
 0x118   :  { %v1006_v48 = vpop.f32.mrb[7].mxu0 }
 0x119   :  { %v647_v49 = vadd.f32 %v1004_v46, %v607_v38 }
 0x11b   :  { %v687_v50 = vadd.f32 %v686_v39, %v647_v49 }
 0x11d   :  { %v692_v51 = vmax.f32 %v687_v50, 0.0 }
 0x11f   :  { %v693_v53 = vpack.c.bf16 %v692_v51, %v692_v51 }
 0x121   :  { %1035 = vmatmul.mubr.msk.bf16.vlgmr.msra.gmra.mrb[8].mxu1 %vm733_vm2, %v693_v53 }
 0x122   :  { %1039 = vmatpush3.bf16.msra.mxu1 %v1121_v52  ;;  %1046 = vmatprep.mubr.msk.bf16.mxu1 %vm1151_vm0, %v1150_v43 }
 0x123   :  { %1040 = vmatprep.subr.bf16.mxu1 %v1150_v43 }
 0x126   :  { %1041 = vmatpush3.bf16.msra.mxu1 %v1122_v54 }
 0x127   :  { %1042 = vmatprep.subr.bf16.mxu1 %v1150_v43 }
 0x12a   :  { %1043 = vmatpush3.bf16.msra.mxu1 %v1123_v55 }
 0x12b   :  { %1044 = vmatprep.subr.bf16.mxu1 %v1150_v43  ;;  %v936_v43 = vld [vmem:[%s1435_s6] ss:$0 sm:$0xff] }
 0x12e   :  { %1045 = vmatpush3.bf16.msra.mxu1 %v1124_v56 }
 0x1f4   :  { %v771_v58 = vpop.f32.mrb[8].mxu1 }
 0x1f5   :  { %v772_v59 = vadd.f32 %v930_v57, %v771_v58  ;;  %v1036_v60 = vpop.f32.mrb[9].mxu1 }
 0x1f6   :  { %v774_v61 = vpop.f32.mrb[10].mxu1 }
 0x1f7   :  { %v777_v62 = vmax.f32 %v772_v59, 0.0  ;;  %v1037_v63 = vpop.f32.mrb[11].mxu1 }
 0x1f9   :  { %v778_v0 = vpack.c.bf16 %v777_v62, %v777_v62 }
 0x1fb   :  { %1047 = vmatmul.mubr.msk.bf16.vlgmr.msra.gmra.mrb[12].mxu1 %vm733_vm2, %v778_v0 }
 0x2ce   :  { %v855_v1 = vpop.f32.mrb[12].mxu1 }
 0x2cf   :  { %v856_v2 = vadd.f32 %v936_v43, %v855_v1  ;;  %v1048_v3 = vpop.f32.mrb[13].mxu1 }
 0x2d0   :  { %v858_v4 = vpop.f32.mrb[14].mxu1 }
 0x2d1   :  { %862 = vst.msk [vmem:[#allocation2] sm:$0xff] %vm861_vm3, %v856_v2  ;;  %v1049_v5 = vpop.f32.mrb[15].mxu1 }
 0x2d2   :  { %867 = vsyncadd [#allocation3], 96  ;;  %s1152_s4 = smov [#allocation2]  }
 0x2d3   :  { %s868_s5 = sshll.u32 %s1152_s4, 4  ;;  %s869_s5 = int_to_ptr.vmem [resolvable:$true] %s868_s5 }
 0x2d4   :  { %s1125_s17 = scalar_lea.vmem %s869_s5, 32  ;;  %s1129_s18 = scalar_lea.vmem %s869_s5, 128 }
 0x2d5   :  { %p1126_p0 = scmp.ne.s32.totalorder %s869_s5, %s1125_s17  ;;  %p1130_p1 = scmp.lt.s32.totalorder %s869_s5, %s869_s5 }
 0x2d6   :  { %p1131_p2 = scmp.lt.s32.totalorder %s1129_s18, %s1125_s17 }
 0x2d8   :  { %p1132_p3 = por %p1131_p2, %p1130_p1 }
 0x2da   :  { %p1133_p4 = pnand %p1132_p3, %p1126_p0 }
 0x2dc   :  { %1136 = shalt.err (!%p1133_p4)
}
 0x2dd   :  { %s1137_s20 = scalar_lea.hbm %s1436_s7, 32 }
 0x2de   :  { %p1138_p5 = scmp.ne.s32.totalorder %s1436_s7, %s1137_s20  ;;  %p1141_p6 = scmp.lt.u32.totalorder %s1137_s20, %s1436_s7 }
 0x2e0   :  { %p1143_p7 = pnand %p1141_p6, %p1138_p5 }
 0x2e2   :  { %1146 = shalt.err (!%p1143_p7)
}
 0x2e3   :  { %s1153_s25 = smov 32   ;;  %s1154_s26 = smov 2  }
 0x2e4   :  { %874 = dma.vmem_to_hbm [thread:$0]  %s869_s5, 32, %s1436_s7, [#allocation3], %s1153_s25, %s1153_s25, %s1154_s26  }
 0x2e5   :  { %1147 = dma.done.wait [#allocation3], 128  }
 0x2e6   :  { %1148 = vsyncadd [#allocation3], 4294967168 }
 0x2e7   :  { %878 = vsyncpa [#allocation3], 1 }

</bundles_post_ra>
